<compile_context>
chip_gen: v5e
topology: v5e:2x2
jax: 0.10.0
libtpu: 0.0.40
codegen_flags: <defaults>
</compile_context>

<pallas_src>
import jax
import jax.numpy as jnp
from jax.experimental import pallas as pl
from jax.experimental.pallas import tpu as pltpu


def _round_up(x: int, m: int) -> int:
    return (x + m - 1) // m * m


def _vmem_budget_bytes() -> int:
    """Per-generation scoped-VMEM budget: physical VMEM minus headroom for
    Mosaic internal scratch, clamped to [32 MiB, 112 MiB]."""
    try:
        cap = int(pltpu.get_tpu_info().vmem_capacity_bytes)
    except Exception:
        cap = 64 << 20  # conservative (v7x-sized) fallback
    return int(min(max(cap - (16 << 20), 32 << 20), 112 << 20))


def _pick_k_tile(d: int, c_pad: int, budget_bytes: int) -> int:
    """Feature-dim (K) tile: full D when the bf16 weight slab comfortably fits
    the VMEM budget; otherwise the largest multiple-of-128 divisor of D that
    does (double-buffered, since weight blocks then change with k)."""
    slab_budget = budget_bytes // 4  # weight's share of VMEM
    if d % 128 != 0 or d * c_pad * 2 <= slab_budget:
        return d
    max_tk = max(128, slab_budget // (2 * c_pad * 2))
    tk = min(d, (max_tk // 128) * 128)
    while tk > 128 and d % tk != 0:
        tk -= 128
    return tk


def prepare_linear_params(weight, bias):
    """One-time prep of nn.Linear params for the kernel (do NOT call per step).

    weight: (num_classes, D) f32, bias: (num_classes,) f32  (PyTorch layout).
    Returns (w_pad, b_pad): ((D, Cp) bf16, (1, Cp) f32), Cp = round_up(C, 128).
    """
    num_classes, d = weight.shape
    c_pad = _round_up(num_classes, 128)
    w_pad = (
        jnp.zeros((d, c_pad), jnp.bfloat16)
        .at[:, :num_classes]
        .set(weight.T.astype(jnp.bfloat16))
    )
    b_pad = (
        jnp.zeros((1, c_pad), jnp.float32)
        .at[0, :num_classes]
        .set(bias.astype(jnp.float32))
    )
    return w_pad, b_pad


def _linear_kernel(x_ref, w_ref, b_ref, o_ref, acc_ref):
    # x_ref: (TB, TK) bf16, w_ref: (TK, Cp) bf16, b_ref: (1, Cp) f32,
    # o_ref: (TB, Cp) f32, acc_ref: (TB, Cp) f32 VMEM scratch.
    k = pl.program_id(1)

    @pl.when(k == 0)
    def _():
        acc_ref[...] = jnp.zeros_like(acc_ref)

    acc_ref[...] += jnp.dot(
        x_ref[...], w_ref[...], preferred_element_type=jnp.float32
    )

    @pl.when(k == pl.num_programs(1) - 1)
    def _():
        o_ref[...] = (acc_ref[...] + b_ref[...]).astype(o_ref.dtype)


def linear_classifier_forward(x_nchw, w_pad, b_pad, num_classes, *, block_b: int = 1024):
    """Forward pass of LinearClassifier with pre-prepared params.

    x_nchw: (B, 3, H, W) float32;  (w_pad, b_pad) from prepare_linear_params.
    Returns (B, num_classes) float32 logits.
    """
    b = x_nchw.shape[0]
    d, c_pad = w_pad.shape

    # Same flattening order as torch's x.view(b, -1) on NCHW; bf16 halves the
    # HBM traffic that dominates this mem-bound kernel.
    x_flat = x_nchw.reshape(b, d).astype(jnp.bfloat16)

    budget = _vmem_budget_bytes()

    # K (feature) tiling only when the resident weight slab would not fit.
    tk = _pick_k_tile(d, c_pad, budget)
    num_k = d // tk

    # Batch tile: multiple of 16 (bf16 sublane packing); >= 2 tiles when B is
    # big enough so both v7x TensorCores get work; capped by block_b and VMEM.
    if b <= 16:
        tb = 16
    else:
        tb = min(block_b, _round_up((b + 1) // 2, 16))

    def _fits(tb_):
        x_bytes = 2 * tb_ * tk * 2                        # double-buffered bf16 x
        w_bytes = (1 if num_k == 1 else 2) * tk * c_pad * 2
        o_bytes = 2 * tb_ * c_pad * 4                     # double-buffered f32 out
        a_bytes = tb_ * c_pad * 4                         # accumulator scratch
        return x_bytes + w_bytes + o_bytes + a_bytes + c_pad * 4 + (4 << 20) <= budget

    while tb > 16 and not _fits(tb):
        tb = _round_up(tb // 2, 16)

    grid = (pl.cdiv(b, tb), num_k)

    cost = pl.CostEstimate(
        flops=2 * b * d * c_pad,
        transcendentals=0,
        bytes_accessed=b * d * 2 + d * c_pad * 2 + b * c_pad * 4 + c_pad * 4,
    )

    def _call(single_buffer_params: bool):
        pm = {"pipeline_mode": pl.Buffered(1)} if single_buffer_params else {}
        w_pm = pm if num_k == 1 else {}  # weight block varies with k when K-tiled
        return pl.pallas_call(
            _linear_kernel,
            out_shape=jax.ShapeDtypeStruct((b, c_pad), jnp.float32),
            grid=grid,
            in_specs=[
                pl.BlockSpec((tb, tk), lambda i, k: (i, k)),               # x tile
                pl.BlockSpec((tk, c_pad), lambda i, k: (k, 0), **w_pm),    # weight
                pl.BlockSpec((1, c_pad), lambda i, k: (0, 0), **pm),       # bias
            ],
            out_specs=pl.BlockSpec((tb, c_pad), lambda i, k: (i, 0)),
            scratch_shapes=[pltpu.VMEM((tb, c_pad), jnp.float32)],
            compiler_params=pltpu.CompilerParams(
                dimension_semantics=("parallel", "arbitrary"),
                vmem_limit_bytes=int(budget),
            ),
            cost_estimate=cost,
        )(x_flat, w_pad, b_pad)

    try:
        out = _call(True)
    except Exception:
        # pipeline_mode=pl.Buffered(1) not supported by this backend/version:
        # fall back to default double-buffering (identical results).
        out = _call(False)

    # Slice off class-lane padding (and masked ragged-batch rows never exist:
    # out already has exactly b rows).
    return out[:, :num_classes]


if __name__ == "__main__":
    # Small shapes consistent with the module: B=2, C_in=3, H=W=16, num_classes=6.
    B, C_in, H, W = 2, 3, 16, 16
    num_classes = 6
    D = C_in * H * W  # 768

    key = jax.random.PRNGKey(0)
    kx, kw, kb = jax.random.split(key, 3)

    x = jax.random.normal(kx, (B, C_in, H, W), dtype=jnp.float32)
    # Mimic nn.Linear default init: uniform(-1/sqrt(D), 1/sqrt(D)).
    bound = 1.0 / jnp.sqrt(jnp.float32(D))
    weight = jax.random.uniform(kw, (num_classes, D), minval=-bound, maxval=bound,
                                dtype=jnp.float32)
    bias = jax.random.uniform(kb, (num_classes,), minval=-bound, maxval=bound,
                              dtype=jnp.float32)

    # One-time parameter prep (hoisted out of the per-call path).
    w_pad, b_pad = prepare_linear_params(weight, bias)

    logits = linear_classifier_forward(x, w_pad, b_pad, num_classes)
    jax.block_until_ready(logits)
    assert logits.shape == (B, num_classes)

    x_flat = x.reshape(B, -1)

    # Kernel-correctness check against a reference with the same bf16 input
    # quantization and f32 accumulation (tight tolerance).
    x_bf = x_flat.astype(jnp.bfloat16).astype(jnp.float32)
    w_bf = weight.astype(jnp.bfloat16).astype(jnp.float32)
    ref_bf16 = jnp.dot(x_bf, w_bf.T, precision=jax.lax.Precision.HIGHEST) + bias
    assert jnp.allclose(logits, ref_bf16, atol=1e-4, rtol=1e-4), (
        float(jnp.max(jnp.abs(logits - ref_bf16))))

    # Semantic check against the full-f32 PyTorch forward (loose tol: bf16 inputs).
    ref_f32 = jnp.dot(x_flat, weight.T, precision=jax.lax.Precision.HIGHEST) + bias
    assert jnp.allclose(logits, ref_f32, atol=3e-2, rtol=3e-2), (
        float(jnp.max(jnp.abs(logits - ref_f32))))

    print("KERNEL_OK")
</pallas_src>

<mosaic_0001>
module attributes {stable_mosaic.version = 11 : i64} {
  func.func @_linear_kernel(%arg0: i32, %arg1: i32, %arg2: memref<16x768xbf16, #tpu.memory_space<vmem>>, %arg3: memref<768x128xbf16, #tpu.memory_space<vmem>>, %arg4: memref<1x128xf32, #tpu.memory_space<vmem>>, %arg5: memref<16x128xf32, #tpu.memory_space<vmem>>, %arg6: memref<16x128xf32, #tpu.memory_space<vmem>>) attributes {dimension_semantics = [#tpu.dimension_semantics<parallel>, #tpu.dimension_semantics<arbitrary>], iteration_bounds = array<i64: 1, 1>, scalar_prefetch = 0 : i64, scratch_operands = 1 : i64, tpu.core_type = #tpu.core_type<tc>, window_params = [{transform_indices = @transform_0, window_bounds = array<i64: 16, 768>}, {pipeline_mode = #tpu.pipeline_mode<synchronous>, transform_indices = @transform_1, window_bounds = array<i64: 768, 128>}, {pipeline_mode = #tpu.pipeline_mode<synchronous>, transform_indices = @transform_2, window_bounds = array<i64: 1, 128>}, {transform_indices = @transform_3, window_bounds = array<i64: 16, 128>}]} {
    %c0_i32 = arith.constant 0 : i32
    %0 = arith.cmpi eq, %arg1, %c0_i32 : i32
    %1 = arith.extui %0 : i1 to i32
    %c0_i32_0 = arith.constant 0 : i32
    %2 = arith.cmpi ne, %1, %c0_i32_0 : i32
    scf.if %2 {
      %cst_10 = arith.constant 0.000000e+00 : f32
      %12 = vector.broadcast %cst_10 : f32 to vector<16x128xf32>
      %c0_11 = arith.constant 0 : index
      %c0_12 = arith.constant 0 : index
      %13 = vector.load %arg6[%c0_11, %c0_12] : memref<16x128xf32, #tpu.memory_space<vmem>>, vector<16x128xf32>
      tpu.vector_store %arg6[%c0_11, %c0_12], %12 {strides = array<i32>} : memref<16x128xf32, #tpu.memory_space<vmem>>, vector<16x128xf32>,
    } else {
    }
    %c0 = arith.constant 0 : index
    %c0_1 = arith.constant 0 : index
    %3 = vector.load %arg6[%c0, %c0_1] : memref<16x128xf32, #tpu.memory_space<vmem>>, vector<16x128xf32>
    %c0_2 = arith.constant 0 : index
    %c0_3 = arith.constant 0 : index
    %4 = vector.load %arg2[%c0_2, %c0_3] : memref<16x768xbf16, #tpu.memory_space<vmem>>, vector<16x768xbf16>
    %c0_4 = arith.constant 0 : index
    %c0_5 = arith.constant 0 : index
    %5 = vector.load %arg3[%c0_4, %c0_5] : memref<768x128xbf16, #tpu.memory_space<vmem>>, vector<768x128xbf16>
    %cst = arith.constant dense<0.000000e+00> : vector<16x128xf32>
    %6 = tpu.matmul %4, %5, %cst {dimension_numbers = #tpu.dot_dimension_numbers<[1], [0], [0], [1], [0, 0, 1, 1], [], []>} : vector<16x768xbf16>, vector<768x128xbf16>, vector<16x128xf32> -> vector<16x128xf32>
    %7 = arith.addf %3, %6 : vector<16x128xf32>
    %c0_6 = arith.constant 0 : index
    %c0_7 = arith.constant 0 : index
    %8 = vector.load %arg6[%c0_6, %c0_7] : memref<16x128xf32, #tpu.memory_space<vmem>>, vector<16x128xf32>
    tpu.vector_store %arg6[%c0_6, %c0_7], %7 {strides = array<i32>} : memref<16x128xf32, #tpu.memory_space<vmem>>, vector<16x128xf32>,
    %c0_i32_8 = arith.constant 0 : i32
    %9 = arith.cmpi eq, %arg1, %c0_i32_8 : i32
    %10 = arith.extui %9 : i1 to i32
    %c0_i32_9 = arith.constant 0 : i32
    %11 = arith.cmpi ne, %10, %c0_i32_9 : i32
    scf.if %11 {
      %c0_10 = arith.constant 0 : index
      %c0_11 = arith.constant 0 : index
      %12 = vector.load %arg6[%c0_10, %c0_11] : memref<16x128xf32, #tpu.memory_space<vmem>>, vector<16x128xf32>
      %c0_12 = arith.constant 0 : index
      %c0_13 = arith.constant 0 : index
      %13 = vector.load %arg4[%c0_12, %c0_13] : memref<1x128xf32, #tpu.memory_space<vmem>>, vector<1x128xf32>
      %14 = vector.broadcast %13 : vector<1x128xf32> to vector<16x128xf32>
      %15 = arith.addf %12, %14 : vector<16x128xf32>
      %c0_14 = arith.constant 0 : index
      %c0_15 = arith.constant 0 : index
      %16 = vector.load %arg5[%c0_14, %c0_15] : memref<16x128xf32, #tpu.memory_space<vmem>>, vector<16x128xf32>
      tpu.vector_store %arg5[%c0_14, %c0_15], %15 {strides = array<i32>} : memref<16x128xf32, #tpu.memory_space<vmem>>, vector<16x128xf32>,
    } else {
    }
    return
  }
  func.func @transform_0(%arg0: i32, %arg1: i32) -> (i32, i32) {
    %c0_i32 = arith.constant 0 : i32
    return %arg0, %arg1 : i32, i32
  }
  func.func @transform_1(%arg0: i32, %arg1: i32) -> (i32, i32) {
    %c0_i32 = arith.constant 0 : i32
    %c0_i32_0 = arith.constant 0 : i32
    return %arg1, %c0_i32 : i32, i32
  }
  func.func @transform_2(%arg0: i32, %arg1: i32) -> (i32, i32) {
    %c0_i32 = arith.constant 0 : i32
    %c0_i32_0 = arith.constant 0 : i32
    %c0_i32_1 = arith.constant 0 : i32
    return %c0_i32, %c0_i32_0 : i32, i32
  }
  func.func @transform_3(%arg0: i32, %arg1: i32) -> (i32, i32) {
    %c0_i32 = arith.constant 0 : i32
    %c0_i32_0 = arith.constant 0 : i32
    return %arg0, %c0_i32 : i32, i32
  }
}

module attributes {stable_mosaic.version = 11 : i64} {
  func.func @_linear_kernel(%arg0: i32, %arg1: i32, %arg2: memref<16x768xbf16, #tpu.memory_space<vmem>>, %arg3: memref<768x128xbf16, #tpu.memory_space<vmem>>, %arg4: memref<1x128xf32, #tpu.memory_space<vmem>>, %arg5: memref<16x128xf32, #tpu.memory_space<vmem>>, %arg6: memref<16x128xf32, #tpu.memory_space<vmem>>) attributes {dimension_semantics = [#tpu.dimension_semantics<parallel>, #tpu.dimension_semantics<arbitrary>], iteration_bounds = array<i64: 1, 1>, scalar_prefetch = 0 : i64, scratch_operands = 1 : i64, tpu.core_type = #tpu.core_type<tc>, window_params = [{transform_indices = @transform_0, window_bounds = array<i64: 16, 768>}, {transform_indices = @transform_1, window_bounds = array<i64: 768, 128>}, {pipeline_mode = #tpu.pipeline_mode<synchronous>, transform_indices = @transform_2, window_bounds = array<i64: 1, 128>}, {transform_indices = @transform_3, window_bounds = array<i64: 16, 128>}]} {
    %c0_i32 = arith.constant 0 : i32
    %0 = arith.cmpi eq, %arg1, %c0_i32 : i32
    %1 = arith.extui %0 : i1 to i32
    %c0_i32_0 = arith.constant 0 : i32
    %2 = arith.cmpi ne, %1, %c0_i32_0 : i32
    scf.if %2 {
      %cst_10 = arith.constant 0.000000e+00 : f32
      %12 = vector.broadcast %cst_10 : f32 to vector<16x128xf32>
      %c0_11 = arith.constant 0 : index
      %c0_12 = arith.constant 0 : index
      %13 = vector.load %arg6[%c0_11, %c0_12] : memref<16x128xf32, #tpu.memory_space<vmem>>, vector<16x128xf32>
      tpu.vector_store %arg6[%c0_11, %c0_12], %12 {strides = array<i32>} : memref<16x128xf32, #tpu.memory_space<vmem>>, vector<16x128xf32>,
    } else {
    }
    %c0 = arith.constant 0 : index
    %c0_1 = arith.constant 0 : index
    %3 = vector.load %arg6[%c0, %c0_1] : memref<16x128xf32, #tpu.memory_space<vmem>>, vector<16x128xf32>
    %c0_2 = arith.constant 0 : index
    %c0_3 = arith.constant 0 : index
    %4 = vector.load %arg2[%c0_2, %c0_3] : memref<16x768xbf16, #tpu.memory_space<vmem>>, vector<16x768xbf16>
    %c0_4 = arith.constant 0 : index
    %c0_5 = arith.constant 0 : index
    %5 = vector.load %arg3[%c0_4, %c0_5] : memref<768x128xbf16, #tpu.memory_space<vmem>>, vector<768x128xbf16>
    %cst = arith.constant dense<0.000000e+00> : vector<16x128xf32>
    %6 = tpu.matmul %4, %5, %cst {dimension_numbers = #tpu.dot_dimension_numbers<[1], [0], [0], [1], [0, 0, 1, 1], [], []>} : vector<16x768xbf16>, vector<768x128xbf16>, vector<16x128xf32> -> vector<16x128xf32>
    %7 = arith.addf %3, %6 : vector<16x128xf32>
    %c0_6 = arith.constant 0 : index
    %c0_7 = arith.constant 0 : index
    %8 = vector.load %arg6[%c0_6, %c0_7] : memref<16x128xf32, #tpu.memory_space<vmem>>, vector<16x128xf32>
    tpu.vector_store %arg6[%c0_6, %c0_7], %7 {strides = array<i32>} : memref<16x128xf32, #tpu.memory_space<vmem>>, vector<16x128xf32>,
    %c0_i32_8 = arith.constant 0 : i32
    %9 = arith.cmpi eq, %arg1, %c0_i32_8 : i32
    %10 = arith.extui %9 : i1 to i32
    %c0_i32_9 = arith.constant 0 : i32
    %11 = arith.cmpi ne, %10, %c0_i32_9 : i32
    scf.if %11 {
      %c0_10 = arith.constant 0 : index
      %c0_11 = arith.constant 0 : index
      %12 = vector.load %arg6[%c0_10, %c0_11] : memref<16x128xf32, #tpu.memory_space<vmem>>, vector<16x128xf32>
      %c0_12 = arith.constant 0 : index
      %c0_13 = arith.constant 0 : index
      %13 = vector.load %arg4[%c0_12, %c0_13] : memref<1x128xf32, #tpu.memory_space<vmem>>, vector<1x128xf32>
      %14 = vector.broadcast %13 : vector<1x128xf32> to vector<16x128xf32>
      %15 = arith.addf %12, %14 : vector<16x128xf32>
      %c0_14 = arith.constant 0 : index
      %c0_15 = arith.constant 0 : index
      %16 = vector.load %arg5[%c0_14, %c0_15] : memref<16x128xf32, #tpu.memory_space<vmem>>, vector<16x128xf32>
      tpu.vector_store %arg5[%c0_14, %c0_15], %15 {strides = array<i32>} : memref<16x128xf32, #tpu.memory_space<vmem>>, vector<16x128xf32>,
    } else {
    }
    return
  }
  func.func @transform_0(%arg0: i32, %arg1: i32) -> (i32, i32) {
    %c0_i32 = arith.constant 0 : i32
    return %arg0, %arg1 : i32, i32
  }
  func.func @transform_1(%arg0: i32, %arg1: i32) -> (i32, i32) {
    %c0_i32 = arith.constant 0 : i32
    %c0_i32_0 = arith.constant 0 : i32
    return %arg1, %c0_i32 : i32, i32
  }
  func.func @transform_2(%arg0: i32, %arg1: i32) -> (i32, i32) {
    %c0_i32 = arith.constant 0 : i32
    %c0_i32_0 = arith.constant 0 : i32
    %c0_i32_1 = arith.constant 0 : i32
    return %c0_i32, %c0_i32_0 : i32, i32
  }
  func.func @transform_3(%arg0: i32, %arg1: i32) -> (i32, i32) {
    %c0_i32 = arith.constant 0 : i32
    %c0_i32_0 = arith.constant 0 : i32
    return %arg0, %c0_i32 : i32, i32
  }
}

</mosaic_0001>

<bundles_post_ra>
// kernel: tpu_custom_call.1
= control target key start
LH: loop header
LB: loop body
LE: loop exit
PB: predicated region body
PF: predicated region fallthrough
CT: control target
= control target key end

     0   :  { %8 = vsyncpa [#allocation4], 0  ;;  %s972_s0 = inlined_call_operand.hbm [shape: bf16[2,768], index: 0, kind: input, shape index: {}]   ;;  %s973_s1 = inlined_call_operand.hbm [shape: bf16[768,128], index: 1, kind: input, shape index: {}]   ;;  %s974_s2 = inlined_call_operand.vmem [shape: f32[1,128], index: 2, kind: input, shape index: {}]   ;;  %s975_s3 = inlined_call_operand.hbm [shape: f32[2,128], index: 3, kind: output, shape index: {}]  }
   0x1   :  { %9 = vsyncpa [#allocation7], 0 }
   0x2   :  { %10 = vsyncpa [#allocation5], 0 }
   0x3   :  { %14 = vsyncadd [#allocation4], 672  ;;  %s15_s14 = sshll.u32 %s972_s0, 4  ;;  %s931_s15 = smov [#allocation3]   ;;  %s16_s14 = int_to_ptr.hbm [resolvable:$true] %s15_s14 }
   0x4   :  { %s17_s16 = sshll.u32 %s931_s15, 4  ;;  %s28_s19 = sshll.u32 %s973_s1, 4  ;;  %s18_s16 = int_to_ptr.vmem [resolvable:$true] %s17_s16  ;;  %s29_s19 = int_to_ptr.hbm [resolvable:$true] %s28_s19 }
   0x5   :  { %s932_s20 = smov 96   ;;  %s933_s21 = smov 6  }
   0x6   :  { %23 = dma.hbm_to_vmem [thread:$0]  %s16_s14, 96, %s18_s16, [#allocation4], %s932_s20, %s932_s20, %s933_s21  }
   0x7   :  { %s934_s22 = smov [#allocation6]   ;;  %s935_s24 = smov 64  }
   0x8   :  { %s30_s23 = sshll.u32 %s934_s22, 4  ;;  %s936_s25 = smov 4   ;;  %s31_s23 = int_to_ptr.vmem [resolvable:$true] %s30_s23 }
   0x9   :  { %36 = dma.hbm_to_vmem [thread:$0]  %s29_s19, 6144, %s31_s23, [#allocation7], %s935_s24, %s935_s24, %s936_s25  }
   0xa   :  { %925 = dma.done.wait [#allocation4], 768  }
   0xb   :  { %926 = vsyncadd [#allocation4], 4294966528 }
   0xc   :  { %927 = dma.done.wait [#allocation7], 6144  }
   0xd   :  { %928 = vsyncadd [#allocation7], 4294961152  ;;  %v802_v0 = vld [vmem:[#allocation6 + $0x38] sm:$0xff]  ;;  %v801_v4 = vld [vmem:[#allocation6 + $0x30] sm:$0xff] }
   0xe   :  { %v810_v1 = vld [vmem:[#allocation6 + $0x78] sm:$0xff]  ;;  %482 = vmatpush.bf16.msra.mxu0 %v802_v0  ;;  %v809_v5 = vld [vmem:[#allocation6 + $0x70] sm:$0xff]  ;;  %v800_v8 = vld [vmem:[#allocation6 + $0x28] sm:$0xff] }
   0xf   :  { %v818_v2 = vld [vmem:[#allocation6 + $0xb8] sm:$0xff]  ;;  %496 = vmatpush.bf16.msra.mxu1 %v810_v1  ;;  %v817_v6 = vld [vmem:[#allocation6 + $0xb0] sm:$0xff]  ;;  %v808_v9 = vld [vmem:[#allocation6 + $0x68] sm:$0xff] }
  0x10   :  { %v826_v3 = vld [vmem:[#allocation6 + $0xf8] sm:$0xff]  ;;  %510 = vmatpush.bf16.msra.mxu2 %v818_v2  ;;  %v825_v7 = vld [vmem:[#allocation6 + $0xf0] sm:$0xff]  ;;  %v816_v10 = vld [vmem:[#allocation6 + $0xa8] sm:$0xff] }
  0x11   :  { %524 = vmatpush.bf16.msra.mxu3 %v826_v3  ;;  %v824_v11 = vld [vmem:[#allocation6 + $0xe8] sm:$0xff]  ;;  %v799_v12 = vld [vmem:[#allocation6 + $0x20] sm:$0xff]  ;;  %v55_v16 = vld [vmem:[#allocation3] sm:$0x3f] }
  0x12   :  { %483 = vmatpush.bf16.msra.mxu0 %v801_v4  ;;  %v807_v13 = vld [vmem:[#allocation6 + $0x60] sm:$0xff]  ;;  %v56_v17 = vld [vmem:[#allocation3 + $0x6] sm:$0x3f]  ;;  %160 = vst [vmem:[#allocation1] ss:$9 sm:$0xff] %v55_v16  ;;  %v796_v32 = vld [vmem:[#allocation6 + $0x8] sm:$0xff] }
  0x13   :  { %497 = vmatpush.bf16.msra.mxu1 %v809_v5  ;;  %v815_v14 = vld [vmem:[#allocation6 + $0xa0] sm:$0xff]  ;;  %v798_v19 = vld [vmem:[#allocation6 + $0x18] sm:$0xff]  ;;  %v59_v24 = vld [vmem:[#allocation3 + $0x18] sm:$0x3f]  ;;  %163 = vst [vmem:[#allocation1 + $0x1] ss:$9 sm:$0xff] %v56_v17 }
  0x14   :  { %511 = vmatpush.bf16.msra.mxu2 %v817_v6  ;;  %v823_v15 = vld [vmem:[#allocation6 + $0xe0] sm:$0xff]  ;;  %v806_v20 = vld [vmem:[#allocation6 + $0x58] sm:$0xff]  ;;  %v60_v25 = vld [vmem:[#allocation3 + $0x1e] sm:$0x3f]  ;;  %172 = vst [vmem:[#allocation1 + $0x4] ss:$9 sm:$0xff] %v59_v24 }
  0x15   :  { %525 = vmatpush.bf16.msra.mxu3 %v825_v7  ;;  %v57_v18 = vld [vmem:[#allocation3 + $0xc] sm:$0x3f]  ;;  %v58_v21 = vld [vmem:[#allocation3 + $0x12] sm:$0x3f]  ;;  %v61_v26 = vld [vmem:[#allocation3 + $0x24] sm:$0x3f] }
  0x16   :  { %484 = vmatpush.bf16.msra.mxu0 %v800_v8  ;;  %v814_v22 = vld [vmem:[#allocation6 + $0x98] sm:$0xff]  ;;  %166 = vst [vmem:[#allocation1 + $0x2] ss:$9 sm:$0xff] %v57_v18  ;;  %v797_v27 = vld [vmem:[#allocation6 + $0x10] sm:$0xff]  ;;  %v804_v33 = vld [vmem:[#allocation6 + $0x48] sm:$0xff] }
  0x17   :  { %498 = vmatpush.bf16.msra.mxu1 %v808_v9  ;;  %v822_v23 = vld [vmem:[#allocation6 + $0xd8] sm:$0xff]  ;;  %169 = vst [vmem:[#allocation1 + $0x3] ss:$9 sm:$0xff] %v58_v21  ;;  %v805_v28 = vld [vmem:[#allocation6 + $0x50] sm:$0xff]  ;;  %v812_v34 = vld [vmem:[#allocation6 + $0x88] sm:$0xff] }
  0x18   :  { %512 = vmatpush.bf16.msra.mxu2 %v816_v10  ;;  %v62_v29 = vld [vmem:[#allocation3 + $0x2a] sm:$0x3f]  ;;  %v813_v30 = vld [vmem:[#allocation6 + $0x90] sm:$0xff]  ;;  %175 = vst [vmem:[#allocation1 + $0x5] ss:$9 sm:$0xff] %v60_v25  ;;  %v820_v35 = vld [vmem:[#allocation6 + $0xc8] sm:$0xff] }
  0x19   :  { %526 = vmatpush.bf16.msra.mxu3 %v824_v11  ;;  %v821_v31 = vld [vmem:[#allocation6 + $0xd0] sm:$0xff]  ;;  %178 = vst [vmem:[#allocation1 + $0x6] ss:$9 sm:$0xff] %v61_v26  ;;  %v795_v36 = vld [vmem:[#allocation6] sm:$0xff]  ;;  %v834_v39 = vld [vmem:[#allocation6 + $0x138] sm:$0xff] }
  0x1a   :  { %485 = vmatpush.bf16.msra.mxu0 %v799_v12  ;;  %181 = vst [vmem:[#allocation1 + $0x7] ss:$9 sm:$0xff] %v62_v29  ;;  %v803_v37 = vld [vmem:[#allocation6 + $0x40] sm:$0xff]  ;;  %v842_v40 = vld [vmem:[#allocation6 + $0x178] sm:$0xff]  ;;  %v833_v45 = vld [vmem:[#allocation6 + $0x130] sm:$0xff] }
  0x1b   :  { %499 = vmatpush.bf16.msra.mxu1 %v807_v13  ;;  %v811_v38 = vld [vmem:[#allocation6 + $0x80] sm:$0xff]  ;;  %v841_v46 = vld [vmem:[#allocation6 + $0x170] sm:$0xff]  ;;  %v832_v48 = vld [vmem:[#allocation6 + $0x128] sm:$0xff] }
  0x1c   :  { %513 = vmatpush.bf16.msra.mxu2 %v815_v14  ;;  %v819_v41 = vld [vmem:[#allocation6 + $0xc0] sm:$0xff]  ;;  %v840_v49 = vld [vmem:[#allocation6 + $0x168] sm:$0xff]  ;;  %v830_v52 = vld [vmem:[#allocation6 + $0x118] sm:$0xff] }
  0x1d   :  { %527 = vmatpush.bf16.msra.mxu3 %v823_v15  ;;  %v831_v50 = vld [vmem:[#allocation6 + $0x120] sm:$0xff]  ;;  %v838_v53 = vld [vmem:[#allocation6 + $0x158] sm:$0xff]  ;;  %v829_v54 = vld [vmem:[#allocation6 + $0x110] sm:$0xff] }
  0x1e   :  { %486 = vmatpush.bf16.msra.mxu0 %v798_v19  ;;  %v839_v51 = vld [vmem:[#allocation6 + $0x160] sm:$0xff]  ;;  %v837_v55 = vld [vmem:[#allocation6 + $0x150] sm:$0xff]  ;;  %v828_v56 = vld [vmem:[#allocation6 + $0x108] sm:$0xff] }
  0x1f   :  { %500 = vmatpush.bf16.msra.mxu1 %v806_v20  ;;  %v836_v57 = vld [vmem:[#allocation6 + $0x148] sm:$0xff]  ;;  %v827_v58 = vld [vmem:[#allocation6 + $0x100] sm:$0xff] }
  0x20   :  { %514 = vmatpush.bf16.msra.mxu2 %v814_v22  ;;  %v835_v59 = vld [vmem:[#allocation6 + $0x140] sm:$0xff]  ;;  %v852_v12 = vld [vmem:[%s974_s2] ss:$0 sm:$0xff] }
  0x21   :  { %528 = vmatpush.bf16.msra.mxu3 %v822_v23  ;;  %v182_v42 = vld [vmem:[#allocation1] sm:$0xff]  ;;  %v183_v43 = vld [vmem:[#allocation1 + $0x9] sm:$0xff]  ;;  %v184_v44 = vld [vmem:[#allocation1 + $0x12] sm:$0xff] }
  0x22   :  { %487 = vmatpush.bf16.msra.mxu0 %v797_v27  ;;  %v185_v47 = vld [vmem:[#allocation1 + $0x1b] sm:$0xff]  ;;  %v186_v60 = vld [vmem:[#allocation1 + $0x24] sm:$0xff]  ;;  %v187_v61 = vld [vmem:[#allocation1 + $0x2d] sm:$0xff] }
  0x23   :  { %501 = vmatpush.bf16.msra.mxu1 %v805_v28 }
  0x24   :  { %515 = vmatpush.bf16.msra.mxu2 %v813_v30 }
  0x25   :  { %529 = vmatpush.bf16.msra.mxu3 %v821_v31 }
  0x26   :  { %488 = vmatpush.bf16.msra.mxu0 %v796_v32 }
  0x27   :  { %502 = vmatpush.bf16.msra.mxu1 %v804_v33 }
  0x28   :  { %516 = vmatpush.bf16.msra.mxu2 %v812_v34 }
  0x29   :  { %530 = vmatpush.bf16.msra.mxu3 %v820_v35 }
  0x2a   :  { %489 = vmatpush.bf16.msra.mxu0 %v795_v36 }
  0x2b   :  { %503 = vmatpush.bf16.msra.mxu1 %v803_v37 }
  0x2c   :  { %517 = vmatpush.bf16.msra.mxu2 %v811_v38 }
  0x2d   :  { %531 = vmatpush.bf16.msra.mxu3 %v819_v41  ;;  %490 = vmatmul.bf16.vlgmr.msra.gmra.mxu0 %v182_v42 }
  0x2e   :  { %538 = vmatpush.bf16.msrb.mxu0 %v834_v39  ;;  %504 = vmatmul.bf16.vlgmr.msra.gmra.mxu1 %v183_v43 }
  0x2f   :  { %552 = vmatpush.bf16.msrb.mxu1 %v842_v40  ;;  %518 = vmatmul.bf16.vlgmr.msra.gmra.mxu2 %v184_v44 }
  0x30   :  { %532 = vmatmul.bf16.vlgmr.msra.gmra.mxu3 %v185_v47 }
  0x32   :  { %539 = vmatpush.bf16.msrb.mxu0 %v833_v45 }
  0x33   :  { %553 = vmatpush.bf16.msrb.mxu1 %v841_v46 }
  0x36   :  { %540 = vmatpush.bf16.msrb.mxu0 %v832_v48 }
  0x37   :  { %554 = vmatpush.bf16.msrb.mxu1 %v840_v49 }
  0x3a   :  { %541 = vmatpush.bf16.msrb.mxu0 %v831_v50 }
  0x3b   :  { %555 = vmatpush.bf16.msrb.mxu1 %v839_v51 }
  0x3e   :  { %542 = vmatpush.bf16.msrb.mxu0 %v830_v52 }
  0x3f   :  { %556 = vmatpush.bf16.msrb.mxu1 %v838_v53 }
  0x42   :  { %543 = vmatpush.bf16.msrb.mxu0 %v829_v54 }
  0x43   :  { %557 = vmatpush.bf16.msrb.mxu1 %v837_v55 }
  0x46   :  { %544 = vmatpush.bf16.msrb.mxu0 %v828_v56 }
  0x47   :  { %558 = vmatpush.bf16.msrb.mxu1 %v836_v57 }
  0x4a   :  { %545 = vmatpush.bf16.msrb.mxu0 %v827_v58 }
  0x4b   :  { %559 = vmatpush.bf16.msrb.mxu1 %v835_v59 }
  0x4d   :  { %546 = vmatmul.bf16.vlgmr.msrb.gmra.mxu0 %v186_v60 }
  0x4e   :  { %560 = vmatmul.bf16.vlgmr.msrb.gmra.mxu1 %v187_v61 }
  0xaa   :  { %v491_v62 = vpop.f32.mrf.mxu0 }
  0xab   :  { %v505_v63 = vpop.f32.mrf.mxu1 }
  0xac   :  { %v506_v1 = vadd.f32 %v505_v63, %v491_v62 }
  0xb2   :  { %v519_v0 = vpop.f32.mrf.mxu2  ;;  %v493_v2 = vpop.f32.mrf.mxu0 }
  0xb3   :  { %v507_v3 = vpop.f32.mrf.mxu1  ;;  %v533_v4 = vpop.f32.mrf.mxu3  ;;  %v520_v5 = vadd.f32 %v519_v0, %v506_v1 }
  0xb4   :  { %v508_v7 = vadd.f32 %v507_v3, %v493_v2 }
  0xb5   :  { %v534_v6 = vadd.f32 %v533_v4, %v520_v5 }
  0xba   :  { %v521_v8 = vpop.f32.mrf.mxu2 }
  0xbb   :  { %v522_v13 = vadd.f32 %v521_v8, %v508_v7  ;;  %v535_v15 = vpop.f32.mrf.mxu3 }
  0xbd   :  { %v536_v17 = vadd.f32 %v535_v15, %v522_v13 }
  0xca   :  { %v547_v9 = vpop.f32.mrf.mxu0 }
  0xcb   :  { %v548_v10 = vadd.f32 %v547_v9, %v534_v6  ;;  %v561_v11 = vpop.f32.mrf.mxu1 }
  0xcd   :  { %v562_v14 = vadd.f32 %v561_v11, %v548_v10 }
  0xcf   :  { %v579_v16 = vadd.f32 %v852_v12, %v562_v14 }
  0xd1   :  { %581 = vst [vmem:[#allocation8] sm:$0xff] %v579_v16 }
  0xd2   :  { %v549_v18 = vpop.f32.mrf.mxu0 }
  0xd3   :  { %v550_v19 = vadd.f32 %v549_v18, %v536_v17  ;;  %v563_v20 = vpop.f32.mrf.mxu1 }
  0xd5   :  { %v564_v21 = vadd.f32 %v563_v20, %v550_v19 }
  0xd7   :  { %v580_v22 = vadd.f32 %v852_v12, %v564_v21 }
  0xd9   :  { %582 = vst [vmem:[#allocation8 + $0x8] sm:$0xff] %v580_v22 }
  0xda   :  { %586 = vsyncadd [#allocation5], 224  ;;  %s589_s28 = sshll.u32 %s975_s3, 4  ;;  %s937_s29 = smov [#allocation8]   ;;  %s590_s28 = int_to_ptr.hbm [resolvable:$true] %s589_s28 }
  0xdb   :  { %s587_s30 = sshll.u32 %s937_s29, 4  ;;  %s938_s2 = smov 32   ;;  %s588_s30 = int_to_ptr.vmem [resolvable:$true] %s587_s30 }
  0xdc   :  { %s939_s4 = smov 2  }
  0xdd   :  { %595 = dma.vmem_to_hbm [thread:$0]  %s588_s30, 32, %s590_s28, [#allocation5], %s938_s2, %s938_s2, %s939_s4  }
  0xde   :  { %929 = dma.done.wait [#allocation5], 256  }
  0xdf   :  { %930 = vsyncadd [#allocation5], 4294967040 }
  0xe0   :  { %600 = vsyncpa [#allocation4], 1 }
  0xe1   :  { %601 = vsyncpa [#allocation7], 1 }
  0xe2   :  { %602 = vsyncpa [#allocation5], 1 }

// kernel: tpu_custom_call.1
= control target key start
LH: loop header
LB: loop body
LE: loop exit
PB: predicated region body
PF: predicated region fallthrough
CT: control target
= control target key end

     0   :  { %8 = vsyncpa [#allocation4], 0  ;;  %s972_s0 = inlined_call_operand.hbm [shape: bf16[2,768], index: 0, kind: input, shape index: {}]   ;;  %s973_s1 = inlined_call_operand.hbm [shape: bf16[768,128], index: 1, kind: input, shape index: {}]   ;;  %s974_s2 = inlined_call_operand.vmem [shape: f32[1,128], index: 2, kind: input, shape index: {}]   ;;  %s975_s3 = inlined_call_operand.hbm [shape: f32[2,128], index: 3, kind: output, shape index: {}]  }
   0x1   :  { %9 = vsyncpa [#allocation7], 0 }
   0x2   :  { %10 = vsyncpa [#allocation5], 0 }
   0x3   :  { %14 = vsyncadd [#allocation4], 672  ;;  %s15_s14 = sshll.u32 %s972_s0, 4  ;;  %s931_s15 = smov [#allocation3]   ;;  %s16_s14 = int_to_ptr.hbm [resolvable:$true] %s15_s14 }
   0x4   :  { %s17_s16 = sshll.u32 %s931_s15, 4  ;;  %s28_s19 = sshll.u32 %s973_s1, 4  ;;  %s18_s16 = int_to_ptr.vmem [resolvable:$true] %s17_s16  ;;  %s29_s19 = int_to_ptr.hbm [resolvable:$true] %s28_s19 }
   0x5   :  { %s932_s20 = smov 96   ;;  %s933_s21 = smov 6  }
   0x6   :  { %23 = dma.hbm_to_vmem [thread:$0]  %s16_s14, 96, %s18_s16, [#allocation4], %s932_s20, %s932_s20, %s933_s21  }
   0x7   :  { %s934_s22 = smov [#allocation6]   ;;  %s935_s24 = smov 64  }
   0x8   :  { %s30_s23 = sshll.u32 %s934_s22, 4  ;;  %s936_s25 = smov 4   ;;  %s31_s23 = int_to_ptr.vmem [resolvable:$true] %s30_s23 }
   0x9   :  { %36 = dma.hbm_to_vmem [thread:$0]  %s29_s19, 6144, %s31_s23, [#allocation7], %s935_s24, %s935_s24, %s936_s25  }
   0xa   :  { %925 = dma.done.wait [#allocation4], 768  }
   0xb   :  { %926 = vsyncadd [#allocation4], 4294966528 }
   0xc   :  { %927 = dma.done.wait [#allocation7], 6144  }
   0xd   :  { %928 = vsyncadd [#allocation7], 4294961152  ;;  %v802_v0 = vld [vmem:[#allocation6 + $0x38] sm:$0xff]  ;;  %v801_v4 = vld [vmem:[#allocation6 + $0x30] sm:$0xff] }
   0xe   :  { %v810_v1 = vld [vmem:[#allocation6 + $0x78] sm:$0xff]  ;;  %482 = vmatpush.bf16.msra.mxu0 %v802_v0  ;;  %v809_v5 = vld [vmem:[#allocation6 + $0x70] sm:$0xff]  ;;  %v800_v8 = vld [vmem:[#allocation6 + $0x28] sm:$0xff] }
   0xf   :  { %v818_v2 = vld [vmem:[#allocation6 + $0xb8] sm:$0xff]  ;;  %496 = vmatpush.bf16.msra.mxu1 %v810_v1  ;;  %v817_v6 = vld [vmem:[#allocation6 + $0xb0] sm:$0xff]  ;;  %v808_v9 = vld [vmem:[#allocation6 + $0x68] sm:$0xff] }
  0x10   :  { %v826_v3 = vld [vmem:[#allocation6 + $0xf8] sm:$0xff]  ;;  %510 = vmatpush.bf16.msra.mxu2 %v818_v2  ;;  %v825_v7 = vld [vmem:[#allocation6 + $0xf0] sm:$0xff]  ;;  %v816_v10 = vld [vmem:[#allocation6 + $0xa8] sm:$0xff] }
  0x11   :  { %524 = vmatpush.bf16.msra.mxu3 %v826_v3  ;;  %v824_v11 = vld [vmem:[#allocation6 + $0xe8] sm:$0xff]  ;;  %v799_v12 = vld [vmem:[#allocation6 + $0x20] sm:$0xff]  ;;  %v55_v16 = vld [vmem:[#allocation3] sm:$0x3f] }
  0x12   :  { %483 = vmatpush.bf16.msra.mxu0 %v801_v4  ;;  %v807_v13 = vld [vmem:[#allocation6 + $0x60] sm:$0xff]  ;;  %v56_v17 = vld [vmem:[#allocation3 + $0x6] sm:$0x3f]  ;;  %160 = vst [vmem:[#allocation1] ss:$9 sm:$0xff] %v55_v16  ;;  %v796_v32 = vld [vmem:[#allocation6 + $0x8] sm:$0xff] }
  0x13   :  { %497 = vmatpush.bf16.msra.mxu1 %v809_v5  ;;  %v815_v14 = vld [vmem:[#allocation6 + $0xa0] sm:$0xff]  ;;  %v798_v19 = vld [vmem:[#allocation6 + $0x18] sm:$0xff]  ;;  %v59_v24 = vld [vmem:[#allocation3 + $0x18] sm:$0x3f]  ;;  %163 = vst [vmem:[#allocation1 + $0x1] ss:$9 sm:$0xff] %v56_v17 }
  0x14   :  { %511 = vmatpush.bf16.msra.mxu2 %v817_v6  ;;  %v823_v15 = vld [vmem:[#allocation6 + $0xe0] sm:$0xff]  ;;  %v806_v20 = vld [vmem:[#allocation6 + $0x58] sm:$0xff]  ;;  %v60_v25 = vld [vmem:[#allocation3 + $0x1e] sm:$0x3f]  ;;  %172 = vst [vmem:[#allocation1 + $0x4] ss:$9 sm:$0xff] %v59_v24 }
  0x15   :  { %525 = vmatpush.bf16.msra.mxu3 %v825_v7  ;;  %v57_v18 = vld [vmem:[#allocation3 + $0xc] sm:$0x3f]  ;;  %v58_v21 = vld [vmem:[#allocation3 + $0x12] sm:$0x3f]  ;;  %v61_v26 = vld [vmem:[#allocation3 + $0x24] sm:$0x3f] }
  0x16   :  { %484 = vmatpush.bf16.msra.mxu0 %v800_v8  ;;  %v814_v22 = vld [vmem:[#allocation6 + $0x98] sm:$0xff]  ;;  %166 = vst [vmem:[#allocation1 + $0x2] ss:$9 sm:$0xff] %v57_v18  ;;  %v797_v27 = vld [vmem:[#allocation6 + $0x10] sm:$0xff]  ;;  %v804_v33 = vld [vmem:[#allocation6 + $0x48] sm:$0xff] }
  0x17   :  { %498 = vmatpush.bf16.msra.mxu1 %v808_v9  ;;  %v822_v23 = vld [vmem:[#allocation6 + $0xd8] sm:$0xff]  ;;  %169 = vst [vmem:[#allocation1 + $0x3] ss:$9 sm:$0xff] %v58_v21  ;;  %v805_v28 = vld [vmem:[#allocation6 + $0x50] sm:$0xff]  ;;  %v812_v34 = vld [vmem:[#allocation6 + $0x88] sm:$0xff] }
  0x18   :  { %512 = vmatpush.bf16.msra.mxu2 %v816_v10  ;;  %v62_v29 = vld [vmem:[#allocation3 + $0x2a] sm:$0x3f]  ;;  %v813_v30 = vld [vmem:[#allocation6 + $0x90] sm:$0xff]  ;;  %175 = vst [vmem:[#allocation1 + $0x5] ss:$9 sm:$0xff] %v60_v25  ;;  %v820_v35 = vld [vmem:[#allocation6 + $0xc8] sm:$0xff] }
  0x19   :  { %526 = vmatpush.bf16.msra.mxu3 %v824_v11  ;;  %v821_v31 = vld [vmem:[#allocation6 + $0xd0] sm:$0xff]  ;;  %178 = vst [vmem:[#allocation1 + $0x6] ss:$9 sm:$0xff] %v61_v26  ;;  %v795_v36 = vld [vmem:[#allocation6] sm:$0xff]  ;;  %v834_v39 = vld [vmem:[#allocation6 + $0x138] sm:$0xff] }
  0x1a   :  { %485 = vmatpush.bf16.msra.mxu0 %v799_v12  ;;  %181 = vst [vmem:[#allocation1 + $0x7] ss:$9 sm:$0xff] %v62_v29  ;;  %v803_v37 = vld [vmem:[#allocation6 + $0x40] sm:$0xff]  ;;  %v842_v40 = vld [vmem:[#allocation6 + $0x178] sm:$0xff]  ;;  %v833_v45 = vld [vmem:[#allocation6 + $0x130] sm:$0xff] }
  0x1b   :  { %499 = vmatpush.bf16.msra.mxu1 %v807_v13  ;;  %v811_v38 = vld [vmem:[#allocation6 + $0x80] sm:$0xff]  ;;  %v841_v46 = vld [vmem:[#allocation6 + $0x170] sm:$0xff]  ;;  %v832_v48 = vld [vmem:[#allocation6 + $0x128] sm:$0xff] }
  0x1c   :  { %513 = vmatpush.bf16.msra.mxu2 %v815_v14  ;;  %v819_v41 = vld [vmem:[#allocation6 + $0xc0] sm:$0xff]  ;;  %v840_v49 = vld [vmem:[#allocation6 + $0x168] sm:$0xff]  ;;  %v830_v52 = vld [vmem:[#allocation6 + $0x118] sm:$0xff] }
  0x1d   :  { %527 = vmatpush.bf16.msra.mxu3 %v823_v15  ;;  %v831_v50 = vld [vmem:[#allocation6 + $0x120] sm:$0xff]  ;;  %v838_v53 = vld [vmem:[#allocation6 + $0x158] sm:$0xff]  ;;  %v829_v54 = vld [vmem:[#allocation6 + $0x110] sm:$0xff] }
  0x1e   :  { %486 = vmatpush.bf16.msra.mxu0 %v798_v19  ;;  %v839_v51 = vld [vmem:[#allocation6 + $0x160] sm:$0xff]  ;;  %v837_v55 = vld [vmem:[#allocation6 + $0x150] sm:$0xff]  ;;  %v828_v56 = vld [vmem:[#allocation6 + $0x108] sm:$0xff] }
  0x1f   :  { %500 = vmatpush.bf16.msra.mxu1 %v806_v20  ;;  %v836_v57 = vld [vmem:[#allocation6 + $0x148] sm:$0xff]  ;;  %v827_v58 = vld [vmem:[#allocation6 + $0x100] sm:$0xff] }
  0x20   :  { %514 = vmatpush.bf16.msra.mxu2 %v814_v22  ;;  %v835_v59 = vld [vmem:[#allocation6 + $0x140] sm:$0xff]  ;;  %v852_v12 = vld [vmem:[%s974_s2] ss:$0 sm:$0xff] }
  0x21   :  { %528 = vmatpush.bf16.msra.mxu3 %v822_v23  ;;  %v182_v42 = vld [vmem:[#allocation1] sm:$0xff]  ;;  %v183_v43 = vld [vmem:[#allocation1 + $0x9] sm:$0xff]  ;;  %v184_v44 = vld [vmem:[#allocation1 + $0x12] sm:$0xff] }
  0x22   :  { %487 = vmatpush.bf16.msra.mxu0 %v797_v27  ;;  %v185_v47 = vld [vmem:[#allocation1 + $0x1b] sm:$0xff]  ;;  %v186_v60 = vld [vmem:[#allocation1 + $0x24] sm:$0xff]  ;;  %v187_v61 = vld [vmem:[#allocation1 + $0x2d] sm:$0xff] }
  0x23   :  { %501 = vmatpush.bf16.msra.mxu1 %v805_v28 }
  0x24   :  { %515 = vmatpush.bf16.msra.mxu2 %v813_v30 }
  0x25   :  { %529 = vmatpush.bf16.msra.mxu3 %v821_v31 }
  0x26   :  { %488 = vmatpush.bf16.msra.mxu0 %v796_v32 }
  0x27   :  { %502 = vmatpush.bf16.msra.mxu1 %v804_v33 }
  0x28   :  { %516 = vmatpush.bf16.msra.mxu2 %v812_v34 }
  0x29   :  { %530 = vmatpush.bf16.msra.mxu3 %v820_v35 }
  0x2a   :  { %489 = vmatpush.bf16.msra.mxu0 %v795_v36 }
  0x2b   :  { %503 = vmatpush.bf16.msra.mxu1 %v803_v37 }
  0x2c   :  { %517 = vmatpush.bf16.msra.mxu2 %v811_v38 }
  0x2d   :  { %531 = vmatpush.bf16.msra.mxu3 %v819_v41  ;;  %490 = vmatmul.bf16.vlgmr.msra.gmra.mxu0 %v182_v42 }
  0x2e   :  { %538 = vmatpush.bf16.msrb.mxu0 %v834_v39  ;;  %504 = vmatmul.bf16.vlgmr.msra.gmra.mxu1 %v183_v43 }
  0x2f   :  { %552 = vmatpush.bf16.msrb.mxu1 %v842_v40  ;;  %518 = vmatmul.bf16.vlgmr.msra.gmra.mxu2 %v184_v44 }
  0x30   :  { %532 = vmatmul.bf16.vlgmr.msra.gmra.mxu3 %v185_v47 }
  0x32   :  { %539 = vmatpush.bf16.msrb.mxu0 %v833_v45 }
  0x33   :  { %553 = vmatpush.bf16.msrb.mxu1 %v841_v46 }
  0x36   :  { %540 = vmatpush.bf16.msrb.mxu0 %v832_v48 }
  0x37   :  { %554 = vmatpush.bf16.msrb.mxu1 %v840_v49 }
  0x3a   :  { %541 = vmatpush.bf16.msrb.mxu0 %v831_v50 }
  0x3b   :  { %555 = vmatpush.bf16.msrb.mxu1 %v839_v51 }
  0x3e   :  { %542 = vmatpush.bf16.msrb.mxu0 %v830_v52 }
  0x3f   :  { %556 = vmatpush.bf16.msrb.mxu1 %v838_v53 }
  0x42   :  { %543 = vmatpush.bf16.msrb.mxu0 %v829_v54 }
  0x43   :  { %557 = vmatpush.bf16.msrb.mxu1 %v837_v55 }
  0x46   :  { %544 = vmatpush.bf16.msrb.mxu0 %v828_v56 }
  0x47   :  { %558 = vmatpush.bf16.msrb.mxu1 %v836_v57 }
  0x4a   :  { %545 = vmatpush.bf16.msrb.mxu0 %v827_v58 }
  0x4b   :  { %559 = vmatpush.bf16.msrb.mxu1 %v835_v59 }
  0x4d   :  { %546 = vmatmul.bf16.vlgmr.msrb.gmra.mxu0 %v186_v60 }
  0x4e   :  { %560 = vmatmul.bf16.vlgmr.msrb.gmra.mxu1 %v187_v61 }
  0xaa   :  { %v491_v62 = vpop.f32.mrf.mxu0 }
  0xab   :  { %v505_v63 = vpop.f32.mrf.mxu1 }
  0xac   :  { %v506_v1 = vadd.f32 %v505_v63, %v491_v62 }
  0xb2   :  { %v519_v0 = vpop.f32.mrf.mxu2  ;;  %v493_v2 = vpop.f32.mrf.mxu0 }
  0xb3   :  { %v507_v3 = vpop.f32.mrf.mxu1  ;;  %v533_v4 = vpop.f32.mrf.mxu3  ;;  %v520_v5 = vadd.f32 %v519_v0, %v506_v1 }
  0xb4   :  { %v508_v7 = vadd.f32 %v507_v3, %v493_v2 }
  0xb5   :  { %v534_v6 = vadd.f32 %v533_v4, %v520_v5 }
  0xba   :  { %v521_v8 = vpop.f32.mrf.mxu2 }
  0xbb   :  { %v522_v13 = vadd.f32 %v521_v8, %v508_v7  ;;  %v535_v15 = vpop.f32.mrf.mxu3 }
  0xbd   :  { %v536_v17 = vadd.f32 %v535_v15, %v522_v13 }
  0xca   :  { %v547_v9 = vpop.f32.mrf.mxu0 }
  0xcb   :  { %v548_v10 = vadd.f32 %v547_v9, %v534_v6  ;;  %v561_v11 = vpop.f32.mrf.mxu1 }
  0xcd   :  { %v562_v14 = vadd.f32 %v561_v11, %v548_v10 }
  0xcf   :  { %v579_v16 = vadd.f32 %v852_v12, %v562_v14 }
  0xd1   :  { %581 = vst [vmem:[#allocation8] sm:$0xff] %v579_v16 }
  0xd2   :  { %v549_v18 = vpop.f32.mrf.mxu0 }
  0xd3   :  { %v550_v19 = vadd.f32 %v549_v18, %v536_v17  ;;  %v563_v20 = vpop.f32.mrf.mxu1 }
  0xd5   :  { %v564_v21 = vadd.f32 %v563_v20, %v550_v19 }
  0xd7   :  { %v580_v22 = vadd.f32 %v852_v12, %v564_v21 }
  0xd9   :  { %582 = vst [vmem:[#allocation8 + $0x8] sm:$0xff] %v580_v22 }
  0xda   :  { %586 = vsyncadd [#allocation5], 224  ;;  %s589_s28 = sshll.u32 %s975_s3, 4  ;;  %s937_s29 = smov [#allocation8]   ;;  %s590_s28 = int_to_ptr.hbm [resolvable:$true] %s589_s28 }
  0xdb   :  { %s587_s30 = sshll.u32 %s937_s29, 4  ;;  %s938_s2 = smov 32   ;;  %s588_s30 = int_to_ptr.vmem [resolvable:$true] %s587_s30 }
  0xdc   :  { %s939_s4 = smov 2  }
  0xdd   :  { %595 = dma.vmem_to_hbm [thread:$0]  %s588_s30, 32, %s590_s28, [#allocation5], %s938_s2, %s938_s2, %s939_s4  }
  0xde   :  { %929 = dma.done.wait [#allocation5], 256  }
  0xdf   :  { %930 = vsyncadd [#allocation5], 4294967040 }
  0xe0   :  { %600 = vsyncpa [#allocation4], 1 }
  0xe1   :  { %601 = vsyncpa [#allocation7], 1 }
  0xe2   :  { %602 = vsyncpa [#allocation5], 1 }

</bundles_post_ra>
